<compile_context>
chip_gen: v6e
topology: v6e:2x2x1
jax: 0.10.0
libtpu: 0.0.40
codegen_flags: <defaults>
</compile_context>

<pallas_src>
import jax
import jax.numpy as jnp
from jax.experimental import pallas as pl
from jax.experimental.pallas import tpu as pltpu

_LN_EPS = 1e-6                        # DINOv2 final LayerNorm epsilon
_VMEM_TARGET_BYTES = 40 * 1024 * 1024


# ---------------------------------------------------------------------------
# Tiling / spec helpers
# ---------------------------------------------------------------------------

def _round_up(n, m):
    return ((n + m - 1) // m) * m


def _row_tile(M, target, align=16):
    """Largest row tile <= min(target, M) that is a multiple of `align` (16 keeps bf16
    sublane packing aligned). Falls back to M itself for tiny inputs (a block equal to
    the full dim is always legal)."""
    if M <= align:
        return M
    return max(align, (min(target, M) // align) * align)


def _vmem_limit_bytes():
    """Scoped-VMEM limit large enough for 512-row tiles (v5e's 16 MiB default is not),
    clamped to 3/4 of physical VMEM so v7x (64 MiB) keeps headroom."""
    try:
        cap = pltpu.get_tpu_info().vmem_capacity_bytes
        return min(_VMEM_TARGET_BYTES, (3 * cap) // 4)
    except Exception:
        return _VMEM_TARGET_BYTES


def _compiler_params(dimension_semantics):
    return pltpu.CompilerParams(dimension_semantics=dimension_semantics,
                                vmem_limit_bytes=_vmem_limit_bytes())


def _resident_spec(block_shape, index_map):
    """BlockSpec for blocks whose block index never changes across the grid (weights,
    biases, LN params, pre-tiled pos-embed). Single-buffered so e.g. the ~6 MiB (D, 3E)
    fused LP weight does not burn a second VMEM buffer; falls back to the default
    double-buffered spec on JAX versions without BlockSpec.pipeline_mode."""
    try:
        return pl.BlockSpec(block_shape, index_map, pipeline_mode=pl.Buffered(1))
    except (TypeError, AttributeError):
        return pl.BlockSpec(block_shape, index_map)


# ---------------------------------------------------------------------------
# Kernel 1: grouped per-modality patch embedding (+ bias + pos-embed epilogue)
# ---------------------------------------------------------------------------

def _grouped_embed_kernel(p_ref, w_ref, b_ref, pos_ref, o_ref):
    # p: (tm, Kp) patch rows; cast to bf16 here (no wrapper-side cast pass).
    # w: (G, Kp, D) -- all modality weights resident in VMEM; g selects the modality.
    g = pl.program_id(1)
    x = p_ref[...].astype(jnp.bfloat16)
    acc = jnp.dot(x, w_ref[g], preferred_element_type=jnp.float32)
    # Epilogue: bias + positional embedding fused, bf16 store (halves writeback).
    o_ref[...] = (acc + b_ref[g] + pos_ref[...]).astype(o_ref.dtype)


def grouped_patch_embed(patches, weights, biases, pos, tm_target=512):
    """Patch embedding for all modality groups in a single pallas_call.

      patches: (G, B*Np, Kp) float  (Kp zero-padded to a multiple of 128)
      weights: (G, Kp, D)           (rows >= true K are zero)
      biases : (G, D)
      pos    : (Np, D)              positional embedding, added in the kernel epilogue
      returns (G, B*Np, D) bf16 = patches[g] @ weights[g] + biases[g] + pos[row % Np]

    Grid = (row tiles, G): the large row axis leads so a v7x megacore shards rows, not
    the 3-way modality axis.  Row tiles cover whole images so the pos block index is
    constant, and all three (Kp, D) weights stay resident (single-buffered) instead of
    being re-fetched every time g cycles.
    """
    G, M, Kp = patches.shape
    _, _, D = weights.shape
    Np = pos.shape[0]
    assert M % Np == 0 and Np % 8 == 0, "whole-image row tiling requires Np % 8 == 0"
    # TODO(synk): Np > tm_target (giant images) would need intra-image row tiles and a
    # modular pos index map; not required for DINOv2-L (Np = 256).
    imgs_per_tile = max(1, min(tm_target // Np, M // Np))
    tm = imgs_per_tile * Np
    pos_block = jnp.tile(pos.astype(jnp.float32), (imgs_per_tile, 1))        # (tm, D)
    grid = (pl.cdiv(M, tm), G)

    return pl.pallas_call(
        _grouped_embed_kernel,
        out_shape=jax.ShapeDtypeStruct((G, M, D), jnp.bfloat16),
        grid=grid,
        in_specs=[
            pl.BlockSpec((None, tm, Kp), lambda i, g: (g, i, 0)),
            _resident_spec((G, Kp, D), lambda i, g: (0, 0, 0)),   # all weights resident
            _resident_spec((G, 1, D), lambda i, g: (0, 0, 0)),
            _resident_spec((tm, D), lambda i, g: (0, 0)),
        ],
        out_specs=pl.BlockSpec((None, tm, D), lambda i, g: (g, i, 0)),
        compiler_params=_compiler_params(("parallel", "parallel")),
    )(
        patches,                                   # cast to bf16 inside the kernel
        weights.astype(jnp.bfloat16),
        biases.reshape(G, 1, D).astype(jnp.float32),
        pos_block,
    )


# ---------------------------------------------------------------------------
# Kernel 2: fused [per-modality final LayerNorm -> FAM average -> 3-head LP]
# ---------------------------------------------------------------------------

def _fam_lp_kernel(rgb_ref, veg_ref, geo_ref, gam_ref, bet_ref, w_ref, b_ref, o_ref):
    # Per-modality LayerNorm in f32, 3-way FAM sum, single (D, 3E) MXU projection.
    # The 1/3 modality average is pre-folded into w_ref at init.
    def _ln(t_ref):
        x = t_ref[...].astype(jnp.float32)
        mu = jnp.mean(x, axis=-1, keepdims=True)
        xc = x - mu
        var = jnp.mean(xc * xc, axis=-1, keepdims=True)
        return xc * jax.lax.rsqrt(var + _LN_EPS) * gam_ref[...] + bet_ref[...]

    s = _ln(rgb_ref) + _ln(veg_ref) + _ln(geo_ref)                       # (tm, D) f32
    acc = jnp.dot(s.astype(jnp.bfloat16), w_ref[...],
                  preferred_element_type=jnp.float32)                    # (tm, 3E) f32
    o_ref[...] = (acc + b_ref[...]).astype(o_ref.dtype)                  # bf16 store


def fam_lp(rgb, veg, geo, ln_w, ln_b, w_fused, b_fused, tm_target=512):
    """rgb/veg/geo: (M, D) *pre-LayerNorm* last-layer tokens of each modality.
    ln_w/ln_b: (D,) final-LN params.  w_fused: (D, 3E) concatenated head weights with
    the 1/3 FAM scale folded in; b_fused: (3E,).
    Returns (M, 3E) bf16 = concat_heads( LP( mean_modalities( LN(tokens) ) ) )."""
    M, D = rgb.shape
    N = w_fused.shape[1]
    tm = _row_tile(M, tm_target)
    grid = (pl.cdiv(M, tm),)

    tok_spec = pl.BlockSpec((tm, D), lambda i: (i, 0))
    return pl.pallas_call(
        _fam_lp_kernel,
        out_shape=jax.ShapeDtypeStruct((M, N), jnp.bfloat16),
        grid=grid,
        in_specs=[tok_spec, tok_spec, tok_spec,
                  _resident_spec((1, D), lambda i: (0, 0)),
                  _resident_spec((1, D), lambda i: (0, 0)),
                  _resident_spec((D, N), lambda i: (0, 0)),
                  _resident_spec((1, N), lambda i: (0, 0))],
        out_specs=pl.BlockSpec((tm, N), lambda i: (i, 0)),
        compiler_params=_compiler_params(("parallel",)),
    )(
        rgb, veg, geo,
        ln_w.reshape(1, D).astype(jnp.float32),
        ln_b.reshape(1, D).astype(jnp.float32),
        w_fused.astype(jnp.bfloat16),
        b_fused.reshape(1, N).astype(jnp.float32),
    )


# ---------------------------------------------------------------------------
# Synthetic frozen encoder stub (external dependency of the PyTorch module)
# ---------------------------------------------------------------------------

class SyntheticThreeFAMEncoder:
    """Deterministic stand-in for the frozen DINOv2-Large encoder exposing
    patch_embed_rgb and per-modality token features.  The final-LayerNorm parameters
    are exposed (ln_w/ln_b) and applied inside the downstream fused FAM+LP kernel
    instead of as a separate XLA pass over the token tensors."""

    MODALITIES = ("rgb", "veg", "geo")

    def __init__(self, key, embed_dim=128, patch_size=8, image_size=32, n_blocks=4):
        self.embed_dim = embed_dim
        self.n_blocks = n_blocks
        self.patch_size = patch_size
        self.image_size = image_size
        side = image_size // patch_size
        self.num_patches = side * side
        self.patch_embed_rgb = True   # mirrors hasattr(encoder, "patch_embed_rgb")

        k_true = 3 * patch_size * patch_size
        # Zero-pad the unfold/contraction dim to a lane-aligned multiple of 128 so the
        # MXU sees full aligned K passes (588 -> 640 at real patch-14 DINOv2-L shapes).
        self.k_true = k_true
        self.k_pad = _round_up(k_true, 128)

        ks = jax.random.split(key, 4)
        w = 0.02 * jax.random.normal(ks[0], (3, k_true, embed_dim), jnp.float32)
        self.patch_w = jnp.pad(
            w, ((0, 0), (0, self.k_pad - k_true), (0, 0))).astype(jnp.bfloat16)
        self.patch_b = jnp.zeros((3, embed_dim), jnp.float32)
        self.pos_embed = 0.02 * jax.random.normal(
            ks[1], (self.num_patches, embed_dim), jnp.float32)
        self.cls_token = 0.02 * jax.random.normal(ks[2], (3, embed_dim), jnp.float32)
        self.ln_w = jnp.ones((embed_dim,), jnp.float32)
        self.ln_b = jnp.zeros((embed_dim,), jnp.float32)

    def _unfold(self, img3):
        # NCHW (3 channels) -> (B * n_patches, C*P*P), zero-padded to k_pad columns.
        B, C, H, W = img3.shape
        P = self.patch_size
        x = img3.reshape(B, C, H // P, P, W // P, P)
        x = jnp.transpose(x, (0, 2, 4, 1, 3, 5))
        x = x.reshape(B * (H // P) * (W // P), C * P * P)
        return jnp.pad(x, ((0, 0), (0, self.k_pad - self.k_true)))

    def forward_features_all(self, img9):
        """Equivalent to three forward_features(img[:, 3m:3m+3], modname=m) calls; the
        three patch-embed matmuls share one grouped Pallas kernel (bias + pos fused)
        and the final LayerNorm is deferred to the fused FAM+LP kernel, so pre-norm
        tokens are returned.
        TODO(synk): the real frozen DINOv2-Large transformer blocks are an external
        submodule; this deterministic stub produces token features of the right shape."""
        B = img9.shape[0]
        patches = jnp.stack(
            [self._unfold(img9[:, 3 * m:3 * m + 3]) for m in range(3)], axis=0)
        tokens = grouped_patch_embed(
            patches, self.patch_w, self.patch_b, self.pos_embed)    # (3, B*Np, D) bf16
        tokens = tokens.reshape(3, B, self.num_patches, self.embed_dim)
        # Synthetic cls token: learned token + patch mean (f32 accumulation).
        cls = self.cls_token[:, None, :] + tokens.mean(axis=2, dtype=jnp.float32)

        feats = []
        for m in range(3):
            feats.append({
                "x_prenorm_clstoken": [cls[m]],          # (B, D)  f32, pre-LN
                "x_prenorm_patchtokens": [tokens[m]],    # (B, Np, D) bf16, pre-LN
            })
        return feats  # ordered rgb, veg, geo


# ---------------------------------------------------------------------------
# DinoV2LargeThreeFAM (Pallas translation of the PyTorch module's own compute)
# ---------------------------------------------------------------------------

class DinoV2LargeThreeFAMPallas:
    HEAD_NAMES = ("A", "B", "C")

    def __init__(self, encoder, embed_dim, key):
        # PyTorch hardcodes image_size=224; kept configurable so the demo runs small
        # while preserving the resize semantics.
        self.image_size = encoder.image_size
        self.encoder = encoder
        self.embed_dim = embed_dim
        D = encoder.embed_dim
        ks = jax.random.split(key, 3)
        # agg_lp = LP(..., use_only_last_layer=True): one projector per head applied to
        # the last-layer averaged cls/patch tokens.
        # TODO(synk): modeling.unic.LP projector internals unavailable; approximated as
        # a per-head linear projection (D -> embed_dim) shared by cls & patch tokens.
        ws = [0.02 * jax.random.normal(k, (D, embed_dim), jnp.float32) for k in ks]
        bs = [jnp.zeros((embed_dim,), jnp.float32) for _ in ks]
        # Fused (D, 3E) weight / (3E,) bias: one MXU pass projects all three heads.
        # The 1/3 FAM modality average is folded into the weight once here.
        self.w_fused = (jnp.concatenate(ws, axis=1) / 3.0).astype(jnp.bfloat16)
        self.b_fused = jnp.concatenate(bs, axis=0)

    def forward(self, img):
        B, C, H, W = img.shape
        if (H, W) != (self.image_size, self.image_size):
            # torch.nn.functional.interpolate(mode='bilinear', align_corners=False)
            img = jax.image.resize(
                img, (B, C, self.image_size, self.image_size),
                method="bilinear", antialias=False)

        if not hasattr(self.encoder, "patch_embed_rgb"):
            # TODO(synk): single-path fallback of the PyTorch module (encoder without
            # per-modality patch embeds) is not exercised by this synthetic setup.
            raise NotImplementedError("single-modality encoder path not implemented")

        rgb_f, veg_f, geo_f = self.encoder.forward_features_all(img)

        D = self.encoder.embed_dim
        Np = self.encoder.num_patches
        T = 1 + Np            # cls token followed by patch tokens
        M = B * T
        E = self.embed_dim

        def pack(f):
            # Pre-LayerNorm tokens straight from the encoder; the final LN, the 3-way
            # FAM average and the LP projection all happen inside one Pallas kernel, so
            # there are no extra (M, D) HBM passes for LN or dtype casts here.
            cls = f["x_prenorm_clstoken"][-1][:, None, :].astype(jnp.bfloat16)
            toks = jnp.concatenate([cls, f["x_prenorm_patchtokens"][-1]], axis=1)
            return toks.reshape(M, D)

        r, v, g = pack(rgb_f), pack(veg_f), pack(geo_f)

        # Fused Pallas kernel: LN per modality -> sum -> @ [W_A|W_B|W_C]/3 + [b_A|b_B|b_C].
        fused = fam_lp(r, v, g, self.encoder.ln_w, self.encoder.ln_b,
                       self.w_fused, self.b_fused)                    # (M, 3E) bf16

        result = {}
        for h, name in enumerate(self.HEAD_NAMES):
            o = fused[:, h * E:(h + 1) * E].reshape(B, T, E)
            result[name] = {"cls": o[:, 0, :], "patch": o[:, 1:, :]}
        return result

    def __call__(self, img):
        return self.forward(img)


# ---------------------------------------------------------------------------
# Pure-JAX (f32) reference of the fused path, for a numerical sanity check
# ---------------------------------------------------------------------------

def _reference_forward_fused(encoder, model, img):
    B = img.shape[0]
    if img.shape[-2:] != (model.image_size, model.image_size):
        img = jax.image.resize(
            img, (B, img.shape[1], model.image_size, model.image_size),
            method="bilinear", antialias=False)
    D, Np = encoder.embed_dim, encoder.num_patches
    seq_sum = 0.0
    for m in range(3):
        p = encoder._unfold(img[:, 3 * m:3 * m + 3])
        t = p @ encoder.patch_w[m].astype(jnp.float32) + encoder.patch_b[m]
        t = t.reshape(B, Np, D) + encoder.pos_embed[None]
        cls = encoder.cls_token[m][None] + t.mean(axis=1)
        seq = jnp.concatenate([cls[:, None, :], t], axis=1)
        mu = seq.mean(-1, keepdims=True)
        var = ((seq - mu) ** 2).mean(-1, keepdims=True)
        seq = (seq - mu) / jnp.sqrt(var + _LN_EPS) * encoder.ln_w + encoder.ln_b
        seq_sum = seq_sum + seq
    M = B * (Np + 1)
    return seq_sum.reshape(M, D) @ model.w_fused.astype(jnp.float32) + model.b_fused


# ---------------------------------------------------------------------------
# Demo
# ---------------------------------------------------------------------------

if __name__ == "__main__":
    key = jax.random.PRNGKey(0)
    k_enc, k_head, k_img = jax.random.split(key, 3)

    # Small shapes consistent with the forward: 9-channel input (rgb|veg|geo), resized
    # to encoder.image_size, patchified, three heads of size embed_dim.
    encoder = SyntheticThreeFAMEncoder(
        k_enc, embed_dim=128, patch_size=8, image_size=32, n_blocks=4)
    model = DinoV2LargeThreeFAMPallas(encoder, embed_dim=128, key=k_head)

    img = jax.random.normal(k_img, (2, 9, 24, 24), jnp.float32)  # resized 24 -> 32

    out = model(img)
    for leaf in jax.tree_util.tree_leaves(out):
        jax.block_until_ready(leaf)

    # Shape sanity.
    assert out["A"]["cls"].shape == (2, 128)
    assert out["A"]["patch"].shape == (2, encoder.num_patches, 128)
    assert out["C"]["patch"].shape == (2, encoder.num_patches, 128)

    # Numerical sanity vs. a pure-JAX f32 reference (kernel uses bf16 activations).
    ref = _reference_forward_fused(encoder, model, img)
    E = model.embed_dim
    got = jnp.concatenate(
        [jnp.concatenate([out[n]["cls"][:, None, :], out[n]["patch"]], axis=1
                         ).reshape(-1, E)
         for n in model.HEAD_NAMES], axis=-1).astype(jnp.float32)
    max_err = float(jnp.max(jnp.abs(got - ref)))
    assert max_err < 5e-2, f"mismatch vs pure-JAX reference: max_err={max_err}"

    print("KERNEL_OK")
</pallas_src>

<mosaic_0001>
module attributes {stable_mosaic.version = 11 : i64} {
  func.func @_grouped_embed_kernel(%arg0: i32, %arg1: i32, %arg2: memref<1x32x256xf32, #tpu.memory_space<vmem>>, %arg3: memref<3x256x128xbf16, #tpu.memory_space<vmem>>, %arg4: memref<3x1x128xf32, #tpu.memory_space<vmem>>, %arg5: memref<32x128xf32, #tpu.memory_space<vmem>>, %arg6: memref<1x32x128xbf16, #tpu.memory_space<vmem>>) attributes {dimension_semantics = [#tpu.dimension_semantics<parallel>, #tpu.dimension_semantics<parallel>], iteration_bounds = array<i64: 1, 3>, scalar_prefetch = 0 : i64, scratch_operands = 0 : i64, tpu.core_type = #tpu.core_type<tc>, window_params = [{transform_indices = @transform_0, window_bounds = array<i64: 1, 32, 256>}, {pipeline_mode = #tpu.pipeline_mode<synchronous>, transform_indices = @transform_1, window_bounds = array<i64: 3, 256, 128>}, {pipeline_mode = #tpu.pipeline_mode<synchronous>, transform_indices = @transform_2, window_bounds = array<i64: 3, 1, 128>}, {pipeline_mode = #tpu.pipeline_mode<synchronous>, transform_indices = @transform_3, window_bounds = array<i64: 32, 128>}, {transform_indices = @transform_4, window_bounds = array<i64: 1, 32, 128>}]} {
    %c0 = arith.constant 0 : index
    %c0_0 = arith.constant 0 : index
    %c0_1 = arith.constant 0 : index
    %0 = vector.load %arg2[%c0, %c0_0, %c0_1] : memref<1x32x256xf32, #tpu.memory_space<vmem>>, vector<1x32x256xf32>
    %1 = vector.shape_cast %0 : vector<1x32x256xf32> to vector<32x256xf32>
    %2 = arith.truncf %1 : vector<32x256xf32> to vector<32x256xbf16>
    %3 = arith.index_cast %arg1 : i32 to index
    %c0_2 = arith.constant 0 : index
    %c0_3 = arith.constant 0 : index
    %4 = vector.load %arg3[%3, %c0_2, %c0_3] : memref<3x256x128xbf16, #tpu.memory_space<vmem>>, vector<1x256x128xbf16>
    %5 = vector.shape_cast %4 : vector<1x256x128xbf16> to vector<256x128xbf16>
    %cst = arith.constant dense<0.000000e+00> : vector<32x128xf32>
    %6 = tpu.matmul %2, %5, %cst {dimension_numbers = #tpu.dot_dimension_numbers<[1], [0], [0], [1], [0, 0, 1, 1], [], []>} : vector<32x256xbf16>, vector<256x128xbf16>, vector<32x128xf32> -> vector<32x128xf32>
    %7 = arith.index_cast %arg1 : i32 to index
    %c0_4 = arith.constant 0 : index
    %c0_5 = arith.constant 0 : index
    %8 = vector.load %arg4[%7, %c0_4, %c0_5] : memref<3x1x128xf32, #tpu.memory_space<vmem>>, vector<1x1x128xf32>
    %9 = vector.shape_cast %8 : vector<1x1x128xf32> to vector<1x128xf32>
    %10 = vector.broadcast %9 : vector<1x128xf32> to vector<32x128xf32>
    %11 = arith.addf %6, %10 : vector<32x128xf32>
    %c0_6 = arith.constant 0 : index
    %c0_7 = arith.constant 0 : index
    %12 = vector.load %arg5[%c0_6, %c0_7] : memref<32x128xf32, #tpu.memory_space<vmem>>, vector<32x128xf32>
    %13 = arith.addf %11, %12 : vector<32x128xf32>
    %14 = arith.truncf %13 : vector<32x128xf32> to vector<32x128xbf16>
    %c0_8 = arith.constant 0 : index
    %c0_9 = arith.constant 0 : index
    %c0_10 = arith.constant 0 : index
    %15 = vector.load %arg6[%c0_8, %c0_9, %c0_10] : memref<1x32x128xbf16, #tpu.memory_space<vmem>>, vector<1x32x128xbf16>
    %16 = vector.shape_cast %15 : vector<1x32x128xbf16> to vector<32x128xbf16>
    %17 = vector.shape_cast %14 : vector<32x128xbf16> to vector<1x32x128xbf16>
    tpu.vector_store %arg6[%c0_8, %c0_9, %c0_10], %17 {strides = array<i32>} : memref<1x32x128xbf16, #tpu.memory_space<vmem>>, vector<1x32x128xbf16>,
    return
  }
  func.func @transform_0(%arg0: i32, %arg1: i32) -> (i32, i32, i32) {
    %c0_i32 = arith.constant 0 : i32
    %c0_i32_0 = arith.constant 0 : i32
    return %arg1, %arg0, %c0_i32 : i32, i32, i32
  }
  func.func @transform_1(%arg0: i32, %arg1: i32) -> (i32, i32, i32) {
    %c0_i32 = arith.constant 0 : i32
    %c0_i32_0 = arith.constant 0 : i32
    %c0_i32_1 = arith.constant 0 : i32
    %c0_i32_2 = arith.constant 0 : i32
    return %c0_i32, %c0_i32_0, %c0_i32_1 : i32, i32, i32
  }
  func.func @transform_2(%arg0: i32, %arg1: i32) -> (i32, i32, i32) {
    %c0_i32 = arith.constant 0 : i32
    %c0_i32_0 = arith.constant 0 : i32
    %c0_i32_1 = arith.constant 0 : i32
    %c0_i32_2 = arith.constant 0 : i32
    return %c0_i32, %c0_i32_0, %c0_i32_1 : i32, i32, i32
  }
  func.func @transform_3(%arg0: i32, %arg1: i32) -> (i32, i32) {
    %c0_i32 = arith.constant 0 : i32
    %c0_i32_0 = arith.constant 0 : i32
    %c0_i32_1 = arith.constant 0 : i32
    return %c0_i32, %c0_i32_0 : i32, i32
  }
  func.func @transform_4(%arg0: i32, %arg1: i32) -> (i32, i32, i32) {
    %c0_i32 = arith.constant 0 : i32
    %c0_i32_0 = arith.constant 0 : i32
    return %arg1, %arg0, %c0_i32 : i32, i32, i32
  }
}

</mosaic_0001>

<bundles_post_ra>
// kernel: tpu_custom_call.1
= control target key start
LH: loop header
LB: loop body
LE: loop exit
PB: predicated region body
PF: predicated region fallthrough
CT: control target
= control target key end

     0   :  { %9 = vsyncpa [#allocation3], 0  ;;  %s1254_s0 = inlined_call_operand.hbm [shape: f32[3,32,256], index: 0, kind: input, shape index: {}]   ;;  %s1255_s1 = inlined_call_operand.hbm [shape: bf16[3,256,128], index: 1, kind: input, shape index: {}]   ;;  %s1256_s2 = inlined_call_operand.vmem [shape: f32[3,1,128], index: 2, kind: input, shape index: {}]   ;;  %s1257_s3 = inlined_call_operand.hbm [shape: f32[32,128], index: 3, kind: input, shape index: {}]   ;;  %s1258_s4 = inlined_call_operand.hbm [shape: bf16[3,32,128], index: 4, kind: output, shape index: {}]  }
   0x1   :  { %11 = vsyncpa [#allocation3 + $0x1], 0 }
   0x2   :  { %12 = vsyncpa [#allocation6], 0 }
   0x3   :  { %13 = vsyncpa [#allocation4], 0 }
   0x4   :  { %15 = vsyncpa [#allocation4 + $0x1], 0  ;;  %s1034_s15 = smov 0   ;;  %s1036_s16 = smov 0  }
   0x5   :  { %s1038_s17 = smov 0   ;;  %s1040_s18 = smov 0  }
   0x6   :  { %s1042_s19 = smov 0   ;;  %s1044_s20 = smov 0  }
   0x7 LB: > { %s620_s21 = sadd.s32 4294967295, %s995_s20   ;;  %s621_s22 = sadd.s32 4294967294, %s995_s20   ;;  %s995_s20 = sphi %s1044_s20, %s21_s20   ;;  %s991_s19 = sphi %s1042_s19, %s1277_s19   ;;  %s987_s18 = sphi %s1040_s18, %s1276_s18   ;;  %s983_s17 = sphi %s1038_s17, %s1275_s17   ;;  %s979_s16 = sphi %s1036_s16, %s1274_s16   ;;  %s975_s15 = sphi %s1034_s15, %s1273_s15  }
   0x8   : > { %p55_p0 = scmp.ne.s32.totalorder %s979_s16, %s975_s15  ;;  %p1068_p1 = scmp.eq.s32.totalorder %s620_s21, 0 }
   0x9   : > { %p1072_p2 = scmp.eq.s32.totalorder %s620_s21, 2  ;;  %p150_p3 = scmp.eq.s32.totalorder %s621_s22, 2 }
   0xa   : > { %s1262_s23 = scalar_select %p1068_p1, 1, 0 }
   0xb   : > { %p1078_p4 = por %p1068_p1, %p55_p0  ;;  %p622_p5 = scmp.ge.s32.totalorder %s995_s20, 1 }
   0xc   : > { %p1083_p6 = por %p150_p3, %p55_p0  ;;  %p157_p7 = scmp.lt.s32.totalorder %s995_s20, 4 }
   0xd   : > { %s1264_s25 = scalar_select %p1078_p4, 1, 0 }
   0xe   : > { %s1265_s26 = scalar_select %p1083_p6, 1, 0 }
   0xf   : > { %p1088_p8 = pnand %p622_p5, %p157_p7  ;;  %s997_s28 = smov [#allocation5]  }
  0x10   : > { %s169_s29 = sshll.u32 %s997_s28, 4  ;;  %s998_s5 = smov [#allocation7]   ;;  %s170_s29 = int_to_ptr.vmem [resolvable:$true] %s169_s29 }
  0x11   : > { %p736_p9 = pneg %p1088_p8  ;;  %s185_s6 = sshll.u32 %s998_s5, 4  ;;  %s186_s6 = int_to_ptr.vmem [resolvable:$true] %s185_s6 }
  0x12   : > { %s842_s7 = scalar_lea.vmem %s170_s29, 6144  ;;  %p850_p3 = scmp.lt.s32.totalorder %s170_s29, %s170_s29 }
  0x13   : > { %p1096_p10 = pnand %p736_p9, %p1068_p1  ;;  %p843_p12 = scmp.ne.s32.totalorder %s170_s29, %s842_s7 }
  0x14   : > { %p851_p5 = scmp.lt.s32.totalorder %s842_s7, %s842_s7 }
  0x15   : > { %p833_p11 = pneg %p1096_p10 }
  0x16   : > { %p852_p7 = por %p851_p5, %p850_p3 }
  0x17   : > { %p845_p13 = pnand %p843_p12, %p833_p11 }
  0x19   : > { %p846_p0 = pneg %p845_p13 }
  0x1b   : > { %p853_p9 = pnand %p852_p7, %p846_p0 }
  0x1d   : > { %856 = shalt.err (!%p853_p9)
}
  0x1e   : > { %s999_s8 = smov 64   ;;  %s1000_s9 = smov 4  }
  0x1f   : > { %739 = dma.hbm_to_vmem [thread:$0]  (!%p1096_p10), %s1255_s1, 6144, %s170_s29, [#allocation6], %s999_s8, %s999_s8, %s1000_s9  }
  0x20   : > { %s868_s12 = scalar_lea.vmem %s186_s6, 512  ;;  %p876_p1 = scmp.lt.s32.totalorder %s186_s6, %s186_s6 }
  0x21   : > { %p869_p6 = scmp.ne.s32.totalorder %s186_s6, %s868_s12  ;;  %p877_p4 = scmp.lt.s32.totalorder %s868_s12, %s868_s12 }
  0x23   : > { %p871_p12 = pnand %p869_p6, %p833_p11  ;;  %p878_p3 = por %p877_p4, %p876_p1 }
  0x25   : > { %p872_p13 = pneg %p871_p12 }
  0x27   : > { %p879_p0 = pnand %p878_p3, %p872_p13 }
  0x29   : > { %882 = shalt.err (!%p879_p0)
}
  0x2a   : > { %s1001_s13 = smov 128   ;;  %s1002_s14 = smov 8  }
  0x2b   : > { %742 = dma.hbm_to_vmem [thread:$0]  (!%p1096_p10), %s1257_s3, 512, %s186_s6, [#allocation6], %s1001_s13, %s1001_s13, %s1002_s14  }
  0x2c   : > { %s30_s28 = sadd.s32 1, %s991_s19  ;;  %s42_s29 = sadd.s32 1, %s983_s17 }
  0x2d   : > { %p31_p1 = scmp.ge.s32.totalorder %s30_s28, 3  ;;  %p49_p4 = scmp.ne.s32.totalorder %s983_s17, %s979_s16 }
  0x2e   : > { %p50_p6 = scmp.eq.s32.totalorder %s995_s20, 0  ;;  %p753_p11 = scmp.lt.s32.totalorder %s995_s20, 3 }
  0x2f   : > { %s1279_s28 = smov (%p31_p1, %s30_s28), 0  ;;  %p1128_p7 = por %p1072_p2, %p49_p4 }
  0x30   : > { %p51_p5 = por %p50_p6, %p49_p4  ;;  %s37_s30 = ssub.s32 %s991_s19, %s1279_s28 }
  0x31   : > { %s199_s7 = sand.u32 1, %s983_s17   ;;  %p40_p9 = scmp.eq.s32.totalorder %s37_s30, 0 }
  0x32   : > { %s626_s6 = sshll.u32 %s199_s7, 6  ;;  %s662_s8 = sshll.u32 %s991_s19, 10 }
  0x33   : > { %s1137_s9 = scalar_select %p40_p9, %s983_s17, %s42_s29  }
  0x34   : > { %s212_s12 = scalar_lea.hbm %s1254_s0, %s662_s8  ;;  %s203_s13 = scalar_lea.vmem [#allocation2], %s626_s6 }
  0x35   : > { %s213_s14 = sshll.u32 %s203_s13, 4  ;;  %p1144_p10 = pnand %p753_p11, %p51_p5  ;;  %s214_s14 = int_to_ptr.vmem [resolvable:$true] %s213_s14 }
  0x36   : > { %s200_s21 = scalar_lea.sflag [#allocation3], %s199_s7  ;;  %s896_s22 = scalar_lea.vmem %s214_s14, 1024 }
  0x37   : > { %p885_p2 = pneg %p1144_p10  ;;  %p897_p12 = scmp.ne.s32.totalorder %s214_s14, %s896_s22 }
  0x38   : > { %s1003_s29 = smov [#allocation2]  }
  0x39   : > { %p899_p13 = pnand %p897_p12, %p885_p2  ;;  %s901_s30 = sshll.u32 %s1003_s29, 4  ;;  %s902_s30 = int_to_ptr.vmem [resolvable:$false] %s901_s30 }
  0x3a   : > { %s903_s8 = scalar_lea.vmem %s902_s30, 2048  ;;  %p904_p0 = scmp.lt.s32.totalorder %s214_s14, %s902_s30 }
  0x3b   : > { %p900_p3 = pneg %p899_p13  ;;  %p905_p1 = scmp.lt.s32.totalorder %s903_s8, %s896_s22 }
  0x3d   : > { %p906_p4 = por %p905_p1, %p904_p0 }
  0x3f   : > { %p907_p6 = pnand %p906_p4, %p900_p3 }
  0x41   : > { %910 = shalt.err (!%p907_p6)
}
  0x42   : > { %s1004_s6 = smov 256   ;;  %s1005_s10 = smov 16  }
  0x43   : > { %746 = dma.hbm_to_vmem [thread:$0]  (!%p1144_p10), %s212_s12, 1024, %s214_s14, %s200_s21, %s1004_s6, %s1004_s6, %s1005_s10  }
  0x44   : > { %225 = sbr.rel (%p1088_p8) target bundleno = 333 (0x14d), region = 36  ;;  %s1155_s7 = sand.u32 (!%p1088_p8), 1, %s979_s16  }
  0x45   : > { %s630_s11 = sshll.u32 (!%p1088_p8), %s1155_s7, 6  ;;  %s228_s13 = scalar_lea.sflag (!%p1088_p8), [#allocation3], %s1155_s7 }
  0x46   : > { %s1159_s22 = scalar_lea.vmem (!%p1088_p8), [#allocation2], %s630_s11  ;;  %p1270_p11 = scmp.ne.s32.totalorder (!%p1088_p8), %s1264_s25, 0 }
  0x49   : > { %962 = dma.done.wait (%p1270_p11), %s228_s13, 1024  }
  0x4a   : > { %964 = vsyncadd (%p1270_p11), %s228_s13, 4294966272  ;;  %p1271_p5 = scmp.ne.s32.totalorder %s1262_s23, 0 }
  0x4c   : > { %966 = dma.done.wait (%p1271_p5), [#allocation6], 6656  }
  0x4d   : > { %968 = vsyncadd (%p1271_p5), [#allocation6], 4294960640  ;;  %s663_s27 = sshll.u32 %s987_s18, 7  ;;  %v268_v11 = vld [vmem:[%s1159_s22 + $0x8] sm:$0xff]  ;;  %v270_v12 = vld [vmem:[%s1159_s22 + $0x18] sm:$0xff]  ;;  %s314_s14 = scalar_lea.vmem %s1256_s2, %s987_s18 }
  0x4e   : > { %s1170_s12 = scalar_lea.vmem [#allocation5], %s663_s27  ;;  %v272_v13 = vld [vmem:[%s1159_s22 + $0x28] sm:$0xff]  ;;  %v276_v14 = vpack.c.bf16 %v270_v12, %v268_v11  ;;  %v274_v15 = vld [vmem:[%s1159_s22 + $0x38] sm:$0xff]  ;;  %v267_v22 = vld [vmem:[%s1159_s22] sm:$0xff]  ;;  %s633_s24 = sshll.u32 %s1155_s7, 4 }
  0x4f   : > { %v815_v0 = vld [vmem:[%s1170_s12 + $0x78] sm:$0xff]   ;;  %v817_v2 = vld [vmem:[%s1170_s12 + $0x70] sm:$0xff]   ;;  %v819_v4 = vld [vmem:[%s1170_s12 + $0x68] sm:$0xff]   ;;  %v278_v16 = vpack.c.bf16 %v274_v15, %v272_v13  ;;  %s263_s21 = scalar_lea.vmem [#allocation8], %s633_s24  ;;  %s668_s30 = sshll.u32 %s987_s18, 8 }
  0x50   : > { %v816_v1 = vld [vmem:[%s1170_s12 + $0x38] sm:$0xff]   ;;  %680 = vmatprep.subr.bf16.mxu0 %v815_v0  ;;  %708 = vmatprep.subr.bf16.mxu1 %v815_v0  ;;  %v818_v3 = vld [vmem:[%s1170_s12 + $0x30] sm:$0xff]   ;;  %v820_v5 = vld [vmem:[%s1170_s12 + $0x28] sm:$0xff]   ;;  %s511_s29 = sshll.u32 %s263_s21, 4  ;;  %s1205_s10 = scalar_lea.hbm %s1258_s4, %s668_s30  ;;  %s1207_s29 = int_to_ptr.vmem [resolvable:$true] %s511_s29 }
  0x51   : > { %681 = vmatpush3.bf16.msra.mxu0 %v816_v1  ;;  %716 = vmatpush3.bf16.msra.mxu1 %v816_v1  ;;  %v821_v6 = vld [vmem:[%s1170_s12 + $0x60] sm:$0xff]   ;;  %v823_v8 = vld [vmem:[%s1170_s12 + $0x58] sm:$0xff]   ;;  %v825_v10 = vld [vmem:[%s1170_s12 + $0x50] sm:$0xff]   ;;  %s496_s11 = scalar_lea.sflag [#allocation4], %s1155_s7  ;;  %s911_s18 = scalar_lea.vmem %s1207_s29, 256 }
  0x52   : > { %682 = vmatprep.subr.bf16.mxu0 %v817_v2  ;;  %709 = vmatprep.subr.bf16.mxu1 %v817_v2  ;;  %v822_v7 = vld [vmem:[%s1170_s12 + $0x20] sm:$0xff]   ;;  %v824_v9 = vld [vmem:[%s1170_s12 + $0x18] sm:$0xff]   ;;  %v826_v17 = vld [vmem:[%s1170_s12 + $0x10] sm:$0xff]   ;;  %p912_p8 = scmp.ne.s32.totalorder %s1207_s29, %s911_s18  ;;  %s1006_s13 = smov [#allocation8]  }
  0x53   : > { %v827_v18 = vld [vmem:[%s1170_s12 + $0x48] sm:$0xff]   ;;  %450 = vmatprep.mubr.bf16.mxu0 %v276_v14  ;;  %458 = vmatprep.mubr.bf16.mxu1 %v278_v16  ;;  %v829_v20 = vld [vmem:[%s1170_s12 + $0x40] sm:$0xff]   ;;  %v269_v23 = vld [vmem:[%s1159_s22 + $0x10] sm:$0xff] }
  0x54   : > { %v828_v19 = vld [vmem:[%s1170_s12 + $0x8] sm:$0xff]   ;;  %v830_v21 = vld [vmem:[%s1170_s12] sm:$0xff]   ;;  %v273_v25 = vld [vmem:[%s1159_s22 + $0x30] sm:$0xff]  ;;  %v275_v26 = vpack.c.bf16 %v269_v23, %v267_v22  ;;  %p913_p9 = pnand %p912_p8, %p1128_p7 }
  0x55   : > { %683 = vmatpush3.bf16.msra.mxu0 %v818_v3  ;;  %717 = vmatpush3.bf16.msra.mxu1 %v818_v3  ;;  %v271_v24 = vld [vmem:[%s1159_s22 + $0x20] sm:$0xff]  ;;  %v469_v44 = vld [vmem:[#allocation7 + $0x10] sm:$0xff]  ;;  %v468_v45 = vld [vmem:[#allocation7 + $0x8] sm:$0xff]  ;;  %s915_s22 = sshll.u32 %s1006_s13, 4  ;;  %s916_s22 = int_to_ptr.vmem [resolvable:$false] %s915_s22 }
  0x56   : > { %684 = vmatprep.subr.bf16.mxu0 %v819_v4  ;;  %710 = vmatprep.subr.bf16.mxu1 %v819_v4  ;;  %v277_v27 = vpack.c.bf16 %v273_v25, %v271_v24  ;;  %v636_v34 = vld [vmem:[%s314_s14] ss:$0 sm:$0xff]  ;;  %v470_v46 = vld [vmem:[#allocation7 + $0x18] sm:$0xff]  ;;  %p914_p10 = pneg %p913_p9  ;;  %s917_s27 = scalar_lea.vmem %s916_s22, 512 }
  0x57   : > { %v467_v40 = vld [vmem:[#allocation7] sm:$0xff]  ;;  %p918_p2 = scmp.lt.s32.totalorder %s1207_s29, %s916_s22  ;;  %p919_p12 = scmp.lt.s32.totalorder %s917_s27, %s911_s18 }
  0x59   : > { %685 = vmatpush3.bf16.msra.mxu0 %v820_v5  ;;  %718 = vmatpush3.bf16.msra.mxu1 %v820_v5  ;;  %p920_p13 = por %p919_p12, %p918_p2 }
  0x5a   : > { %686 = vmatprep.subr.bf16.mxu0 %v821_v6  ;;  %711 = vmatprep.subr.bf16.mxu1 %v821_v6 }
  0x5b   : > { %p921_p3 = pnand %p920_p13, %p914_p10 }
  0x5d   : > { %687 = vmatpush3.bf16.msra.mxu0 %v822_v7  ;;  %719 = vmatpush3.bf16.msra.mxu1 %v822_v7 }
  0x5e   : > { %688 = vmatprep.subr.bf16.mxu0 %v823_v8  ;;  %712 = vmatprep.subr.bf16.mxu1 %v823_v8 }
  0x61   : > { %689 = vmatpush3.bf16.msra.mxu0 %v824_v9  ;;  %720 = vmatpush3.bf16.msra.mxu1 %v824_v9 }
  0x62   : > { %690 = vmatprep.subr.bf16.mxu0 %v825_v10  ;;  %713 = vmatprep.subr.bf16.mxu1 %v825_v10 }
  0x65   : > { %691 = vmatpush3.bf16.msra.mxu0 %v826_v17  ;;  %721 = vmatpush3.bf16.msra.mxu1 %v826_v17 }
  0x66   : > { %692 = vmatprep.subr.bf16.mxu0 %v827_v18  ;;  %714 = vmatprep.subr.bf16.mxu1 %v827_v18 }
  0x69   : > { %693 = vmatpush3.bf16.msra.mxu0 %v828_v19  ;;  %722 = vmatpush3.bf16.msra.mxu1 %v828_v19 }
  0x6a   : > { %694 = vmatprep.subr.bf16.mxu0 %v829_v20  ;;  %715 = vmatprep.subr.bf16.mxu1 %v829_v20 }
  0x6d   : > { %695 = vmatpush3.bf16.msra.mxu0 %v830_v21  ;;  %723 = vmatpush3.bf16.msra.mxu1 %v830_v21 }
  0x70   : > { %451 = vmatmul.mubr.bf16.vlgmr.msra.gmra.mxu0 %v275_v26  ;;  %459 = vmatmul.mubr.bf16.vlgmr.msra.gmra.mxu1 %v277_v27 }
 0x130   : > { %v696_v28 = vpop.f32.mrf.mxu0  ;;  %v702_v29 = vpop.f32.mrf.mxu1 }
 0x132   : > { %v697_v30 = vpop.f32.mrf.mxu0  ;;  %v703_v31 = vpop.f32.mrf.mxu1 }
 0x133   : > { %v698_v32 = vadd.f32 %v697_v30, %v696_v28  ;;  %v704_v33 = vadd.f32 %v703_v31, %v702_v29 }
 0x134   : > { %v699_v35 = vpop.f32.mrf.mxu0  ;;  %v705_v36 = vpop.f32.mrf.mxu1 }
 0x135   : > { %v453_v39 = vadd.f32 %v698_v32, %v636_v34  ;;  %v461_v41 = vadd.f32 %v704_v33, %v636_v34 }
 0x136   : > { %v700_v37 = vpop.f32.mrf.mxu0  ;;  %v706_v38 = vpop.f32.mrf.mxu1 }
 0x137   : > { %v701_v42 = vadd.f32 %v700_v37, %v699_v35  ;;  %v707_v43 = vadd.f32 %v706_v38, %v705_v36  ;;  %v471_v49 = vadd.f32 %v467_v40, %v453_v39  ;;  %v473_v50 = vadd.f32 %v469_v44, %v461_v41 }
 0x139   : > { %v456_v47 = vadd.f32 %v701_v42, %v636_v34  ;;  %v464_v48 = vadd.f32 %v707_v43, %v636_v34 }
 0x13b   : > { %v472_v51 = vadd.f32 %v468_v45, %v456_v47  ;;  %v474_v52 = vadd.f32 %v470_v46, %v464_v48 }
 0x13d   : > { %v672_v53 = vpack.c.bf16 %v472_v51, %v471_v49  ;;  %v677_v54 = vpack.c.bf16 %v474_v52, %v473_v50 }
 0x13f   : > { %673 = vst [vmem:[%s263_s21] sm:$0xff] %v672_v53   ;;  %679 = vst [vmem:[%s263_s21 + $0x8] sm:$0xff] %v677_v54  }
 0x140   : > { %924 = shalt.err (!%p921_p3)
}
 0x141   : > { %s925_s12 = scalar_lea.hbm %s1205_s10, 256  ;;  %s929_s14 = scalar_lea.hbm %s1258_s4, 768 }
 0x142   : > { %p926_p0 = scmp.ne.s32.totalorder %s1205_s10, %s925_s12  ;;  %p930_p6 = scmp.lt.s32.totalorder %s1205_s10, %s1258_s4 }
 0x143   : > { %p931_p11 = scmp.lt.s32.totalorder %s929_s14, %s925_s12 }
 0x144   : > { %p927_p1 = pnand %p926_p0, %p1128_p7 }
 0x145   : > { %p932_p5 = por %p931_p11, %p930_p6 }
 0x146   : > { %p928_p4 = pneg %p927_p1 }
 0x148   : > { %p933_p8 = pnand %p932_p5, %p928_p4 }
 0x14a   : > { %936 = shalt.err (!%p933_p8)
}
 0x14b   : > { %s1007_s30 = smov 64   ;;  %s1008_s8 = smov 4  }
 0x14c   : > { %734 = dma.vmem_to_hbm [thread:$0]  (%p1128_p7), %s1207_s29, 256, %s1205_s10, %s496_s11, %s1007_s30, %s1007_s30, %s1008_s8  }
 0x14d PF: > { %p756_p9 = scmp.ge.s32.totalorder %s995_s20, 2  ;;  %s526_s6 = sand.u32 1, %s975_s15  }
 0x14e   : > { %p1272_p10 = scmp.ne.s32.totalorder %s1265_s26, 0  ;;  %s527_s18 = scalar_lea.sflag [#allocation4], %s526_s6 }
 0x150   : > { %p748_p2 = pnand %p756_p9, %p1272_p10 }
 0x152   : > { %p749_p12 = pneg %p748_p2 }
 0x154   : > { %970 = dma.done.wait (%p749_p12), %s527_s18, 256  }
 0x155   : > { %972 = vsyncadd (%p749_p12), %s527_s18, 4294967040  ;;  %s21_s20 = sadd.s32 1, %s995_s20   ;;  %s1273_s15 = smov %s979_s16 }
 0x156   : > { %p18_p13 = scmp.ge.s32.totalorder %s21_s20, 5   ;;  %s1274_s16 = smov %s983_s17 }
 0x157   : > { %s1275_s17 = smov %s1137_s9  ;;  %s1276_s18 = smov %s991_s19 }
 0x158   : > { %s1277_s19 = smov %s1279_s28  ;;  %20 = sbr.rel (!%p18_p13) target bundleno = 7 (0x7), region = 91 }
 0x15d   :  { %532 = vsyncpa [#allocation3], 1 }
 0x15e   :  { %534 = vsyncpa [#allocation3 + $0x1], 1 }
 0x15f   :  { %535 = vsyncpa [#allocation6], 1 }
 0x160   :  { %536 = vsyncpa [#allocation4], 1 }
 0x161   :  { %538 = vsyncpa [#allocation4 + $0x1], 1 }

</bundles_post_ra>
